<compile_context>
chip_gen: v6e
topology: v6e:2x2x1
jax: 0.10.0
libtpu: 0.0.40
codegen_flags: <defaults>
</compile_context>

<pallas_src>
import functools

import jax
import jax.numpy as jnp
from jax import lax
from jax.experimental import pallas as pl
from jax.experimental.pallas import tpu as pltpu


def _round_up(v: int, m: int) -> int:
    return ((v + m - 1) // m) * m


def _patchify_matmul_kernel(lhs_ref, rhs_ref, bias_ref, out_ref, acc_ref, *, precision):
    """One (tm, tk) @ (tk, tn) MXU tile with f32 accumulation; bias fused at finalize."""
    @pl.when(pl.program_id(2) == 0)
    def _():
        acc_ref[...] = jnp.zeros_like(acc_ref)

    acc_ref[...] += jnp.dot(
        lhs_ref[...], rhs_ref[...],
        preferred_element_type=jnp.float32,
        precision=precision,
    )

    @pl.when(pl.program_id(2) == pl.num_programs(2) - 1)
    def _():
        out_ref[...] = (acc_ref[...] + bias_ref[...]).astype(out_ref.dtype)


def _tiled_projection(lhs, w_mat, bias_vec, *, tm_max=256, tn_max=256, tk_max=512,
                      precision=lax.Precision.HIGHEST):
    """out = lhs @ w_mat + bias via a Pallas tiled-matmul kernel.

    lhs:   (M, K) patch tokens; w_mat: (K, N) projection; bias_vec: (N,) or None.
    """
    M, K = lhs.shape
    K2, N = w_mat.shape
    assert K == K2

    tm = min(tm_max, _round_up(M, 8))
    tn = min(tn_max, _round_up(N, 128))
    tk = min(tk_max, _round_up(K, 128))
    M_pad, N_pad, K_pad = _round_up(M, tm), _round_up(N, tn), _round_up(K, tk)

    if (M_pad, K_pad) != (M, K):
        lhs = jnp.pad(lhs, ((0, M_pad - M), (0, K_pad - K)))
    if (K_pad, N_pad) != (K, N):
        w_mat = jnp.pad(w_mat, ((0, K_pad - K), (0, N_pad - N)))
    if bias_vec is None:
        bias_row = jnp.zeros((1, N_pad), jnp.float32)
    else:
        bias_row = jnp.pad(bias_vec.astype(jnp.float32), (0, N_pad - N)).reshape(1, N_pad)

    grid = (M_pad // tm, N_pad // tn, K_pad // tk)
    kernel = functools.partial(_patchify_matmul_kernel, precision=precision)

    out = pl.pallas_call(
        kernel,
        out_shape=jax.ShapeDtypeStruct((M_pad, N_pad), lhs.dtype),
        grid_spec=pltpu.PrefetchScalarGridSpec(
            num_scalar_prefetch=0,
            grid=grid,
            in_specs=[
                pl.BlockSpec((tm, tk), lambda i, j, k: (i, k)),   # patch tokens
                pl.BlockSpec((tk, tn), lambda i, j, k: (k, j)),   # projection weight
                pl.BlockSpec((1, tn), lambda i, j, k: (0, j)),    # bias row
            ],
            out_specs=pl.BlockSpec((tm, tn), lambda i, j, k: (i, j)),
            scratch_shapes=[pltpu.VMEM((tm, tn), jnp.float32)],
        ),
        compiler_params=pltpu.CompilerParams(
            dimension_semantics=("parallel", "parallel", "arbitrary")),
    )(lhs, w_mat, bias_row)

    return out[:M, :N]


def patchify_3d_forward(x, weight, bias=None, *, channel_size, data_size, patch_size,
                        hidden_size, convolved=False,
                        precision=lax.Precision.HIGHEST):
    """JAX/Pallas equivalent of Patchify_3D.forward.

    x:      (B, *channel_size, T, H, W)
    weight: Conv3d weight:
              convolved=True : (hidden, C_in, p0, p1, p2)
              convolved=False: (hidden, 1,    p0, p1, p2)   (groups == C_in)
    bias:   (hidden,) or None
    Returns (B, hidden, T', H', W') — the Conv3d output, exactly as the
    PyTorch forward returns it.
    """
    channel_size = (list(channel_size) if isinstance(channel_size, (list, tuple))
                    else [channel_size])
    c_in = 1
    for c in channel_size:
        c_in *= c
    p0, p1, p2 = patch_size
    B = x.shape[0]
    T, H, W = x.shape[-3:]
    assert (T, H, W) == tuple(data_size)
    assert T % p0 == 0 and H % p1 == 0 and W % p2 == 0
    Tn, Hn, Wn = T // p0, H // p1, W // p2
    K = c_in * p0 * p1 * p2

    # x.flatten(start_dim=1, end_dim=-4): collapse all channel dims into one.
    x = x.reshape(B, c_in, T, H, W)

    # --- im2col (pure layout): rows = (b, t', h', w'), cols = (c, pt, ph, pw)
    patches = x.reshape(B, c_in, Tn, p0, Hn, p1, Wn, p2)
    patches = patches.transpose(0, 2, 4, 6, 1, 3, 5, 7)        # (B,Tn,Hn,Wn,C,p0,p1,p2)
    lhs = patches.reshape(B * Tn * Hn * Wn, K)

    # --- dense (K, hidden) projection weight (grouped conv -> block-sparse dense)
    if convolved:
        w_mat = weight.reshape(hidden_size, K).T
    else:
        assert hidden_size % c_in == 0, "grouped conv needs hidden_size % C_in == 0"
        per_group = hidden_size // c_in
        group_of_out = jnp.arange(hidden_size) // per_group                 # (hidden,)
        sel = group_of_out[:, None] == jnp.arange(c_in)[None, :]            # (hidden, C_in)
        w_dense = jnp.where(sel[:, :, None, None, None], weight, 0.0)       # (hidden,C_in,p0,p1,p2)
        w_mat = w_dense.reshape(hidden_size, K).T

    out = _tiled_projection(lhs, w_mat.astype(lhs.dtype), bias, precision=precision)

    # (B*Tn*Hn*Wn, hidden) -> (B, hidden, Tn, Hn, Wn) to match nn.Conv3d output.
    return out.reshape(B, Tn, Hn, Wn, hidden_size).transpose(0, 4, 1, 2, 3)


if __name__ == "__main__":
    # Small deterministic config consistent with the module's __init__.
    channel_size = [2, 2]            # flattened to C_in = 4 by forward()
    data_size = [8, 8, 8]
    patch_size = [2, 2, 2]
    hidden_size = 128                # lane-dense; divisible by C_in for grouped conv
    batch = 2
    c_in = 4

    key = jax.random.PRNGKey(0)
    kx, kw1, kw2, kb = jax.random.split(key, 4)

    x = jax.random.normal(kx, (batch, *channel_size, *data_size), dtype=jnp.float32)
    x_flat = x.reshape(batch, c_in, *data_size)

    # ---------- default path: grouped conv (convolved=False), bias=False ----------
    w_grp = jax.random.normal(kw1, (hidden_size, 1, *patch_size), dtype=jnp.float32) * 0.02
    out_grp = patchify_3d_forward(
        x, w_grp, None, channel_size=channel_size, data_size=data_size,
        patch_size=patch_size, hidden_size=hidden_size, convolved=False)
    out_grp = jax.block_until_ready(out_grp)

    ref_grp = lax.conv_general_dilated(
        x_flat, w_grp, window_strides=tuple(patch_size), padding="VALID",
        dimension_numbers=("NCDHW", "OIDHW", "NCDHW"),
        feature_group_count=c_in, precision=lax.Precision.HIGHEST)
    assert out_grp.shape == ref_grp.shape, (out_grp.shape, ref_grp.shape)
    assert jnp.allclose(out_grp, ref_grp, atol=1e-4, rtol=1e-4), "grouped-conv path mismatch"

    # ---------- convolved path (dense conv) with bias ----------
    w_full = jax.random.normal(kw2, (hidden_size, c_in, *patch_size), dtype=jnp.float32) * 0.02
    b_full = jax.random.normal(kb, (hidden_size,), dtype=jnp.float32)
    out_full = patchify_3d_forward(
        x, w_full, b_full, channel_size=channel_size, data_size=data_size,
        patch_size=patch_size, hidden_size=hidden_size, convolved=True)
    out_full = jax.block_until_ready(out_full)

    ref_full = lax.conv_general_dilated(
        x_flat, w_full, window_strides=tuple(patch_size), padding="VALID",
        dimension_numbers=("NCDHW", "OIDHW", "NCDHW"),
        feature_group_count=1, precision=lax.Precision.HIGHEST)
    ref_full = ref_full + b_full[None, :, None, None, None]
    assert jnp.allclose(out_full, ref_full, atol=1e-4, rtol=1e-4), "convolved path mismatch"

    print("KERNEL_OK")
</pallas_src>

<mosaic_0001>
module attributes {stable_mosaic.version = 11 : i64} {
  func.func @_patchify_matmul_kernel(%arg0: i32, %arg1: i32, %arg2: i32, %arg3: memref<128x128xf32, #tpu.memory_space<vmem>>, %arg4: memref<128x128xf32, #tpu.memory_space<vmem>>, %arg5: memref<1x128xf32, #tpu.memory_space<vmem>>, %arg6: memref<128x128xf32, #tpu.memory_space<vmem>>, %arg7: memref<128x128xf32, #tpu.memory_space<vmem>>) attributes {dimension_semantics = [#tpu.dimension_semantics<parallel>, #tpu.dimension_semantics<parallel>, #tpu.dimension_semantics<arbitrary>], iteration_bounds = array<i64: 1, 1, 1>, scalar_prefetch = 0 : i64, scratch_operands = 1 : i64, tpu.core_type = #tpu.core_type<tc>, window_params = [{transform_indices = @transform_0, window_bounds = array<i64: 128, 128>}, {transform_indices = @transform_1, window_bounds = array<i64: 128, 128>}, {transform_indices = @transform_2, window_bounds = array<i64: 1, 128>}, {transform_indices = @transform_3, window_bounds = array<i64: 128, 128>}]} {
    %c0_i32 = arith.constant 0 : i32
    %0 = arith.cmpi eq, %arg2, %c0_i32 : i32
    %1 = arith.extui %0 : i1 to i32
    %c0_i32_0 = arith.constant 0 : i32
    %2 = arith.cmpi ne, %1, %c0_i32_0 : i32
    scf.if %2 {
      %cst_10 = arith.constant 0.000000e+00 : f32
      %12 = vector.broadcast %cst_10 : f32 to vector<128x128xf32>
      %c0_11 = arith.constant 0 : index
      %c0_12 = arith.constant 0 : index
      %13 = vector.load %arg7[%c0_11, %c0_12] : memref<128x128xf32, #tpu.memory_space<vmem>>, vector<128x128xf32>
      tpu.vector_store %arg7[%c0_11, %c0_12], %12 {strides = array<i32>} : memref<128x128xf32, #tpu.memory_space<vmem>>, vector<128x128xf32>,
    } else {
    }
    %c0 = arith.constant 0 : index
    %c0_1 = arith.constant 0 : index
    %3 = vector.load %arg7[%c0, %c0_1] : memref<128x128xf32, #tpu.memory_space<vmem>>, vector<128x128xf32>
    %c0_2 = arith.constant 0 : index
    %c0_3 = arith.constant 0 : index
    %4 = vector.load %arg3[%c0_2, %c0_3] : memref<128x128xf32, #tpu.memory_space<vmem>>, vector<128x128xf32>
    %c0_4 = arith.constant 0 : index
    %c0_5 = arith.constant 0 : index
    %5 = vector.load %arg4[%c0_4, %c0_5] : memref<128x128xf32, #tpu.memory_space<vmem>>, vector<128x128xf32>
    %cst = arith.constant dense<0.000000e+00> : vector<128x128xf32>
    %6 = tpu.matmul %4, %5, %cst {dimension_numbers = #tpu.dot_dimension_numbers<[1], [0], [0], [1], [0, 0, 1, 1], [], []>, precision = #tpu.contract_precision<fp32>} : vector<128x128xf32>, vector<128x128xf32>, vector<128x128xf32> -> vector<128x128xf32>
    %7 = arith.addf %3, %6 : vector<128x128xf32>
    %c0_6 = arith.constant 0 : index
    %c0_7 = arith.constant 0 : index
    %8 = vector.load %arg7[%c0_6, %c0_7] : memref<128x128xf32, #tpu.memory_space<vmem>>, vector<128x128xf32>
    tpu.vector_store %arg7[%c0_6, %c0_7], %7 {strides = array<i32>} : memref<128x128xf32, #tpu.memory_space<vmem>>, vector<128x128xf32>,
    %c0_i32_8 = arith.constant 0 : i32
    %9 = arith.cmpi eq, %arg2, %c0_i32_8 : i32
    %10 = arith.extui %9 : i1 to i32
    %c0_i32_9 = arith.constant 0 : i32
    %11 = arith.cmpi ne, %10, %c0_i32_9 : i32
    scf.if %11 {
      %c0_10 = arith.constant 0 : index
      %c0_11 = arith.constant 0 : index
      %12 = vector.load %arg7[%c0_10, %c0_11] : memref<128x128xf32, #tpu.memory_space<vmem>>, vector<128x128xf32>
      %c0_12 = arith.constant 0 : index
      %c0_13 = arith.constant 0 : index
      %13 = vector.load %arg5[%c0_12, %c0_13] : memref<1x128xf32, #tpu.memory_space<vmem>>, vector<1x128xf32>
      %14 = vector.broadcast %13 : vector<1x128xf32> to vector<128x128xf32>
      %15 = arith.addf %12, %14 : vector<128x128xf32>
      %c0_14 = arith.constant 0 : index
      %c0_15 = arith.constant 0 : index
      %16 = vector.load %arg6[%c0_14, %c0_15] : memref<128x128xf32, #tpu.memory_space<vmem>>, vector<128x128xf32>
      tpu.vector_store %arg6[%c0_14, %c0_15], %15 {strides = array<i32>} : memref<128x128xf32, #tpu.memory_space<vmem>>, vector<128x128xf32>,
    } else {
    }
    return
  }
  func.func @transform_0(%arg0: i32, %arg1: i32, %arg2: i32) -> (i32, i32) {
    %c0_i32 = arith.constant 0 : i32
    return %arg0, %arg2 : i32, i32
  }
  func.func @transform_1(%arg0: i32, %arg1: i32, %arg2: i32) -> (i32, i32) {
    %c0_i32 = arith.constant 0 : i32
    return %arg2, %arg1 : i32, i32
  }
  func.func @transform_2(%arg0: i32, %arg1: i32, %arg2: i32) -> (i32, i32) {
    %c0_i32 = arith.constant 0 : i32
    %c0_i32_0 = arith.constant 0 : i32
    return %c0_i32, %arg1 : i32, i32
  }
  func.func @transform_3(%arg0: i32, %arg1: i32, %arg2: i32) -> (i32, i32) {
    %c0_i32 = arith.constant 0 : i32
    return %arg0, %arg1 : i32, i32
  }
}

</mosaic_0001>

<bundles_post_ra>
// kernel: tpu_custom_call.1
= control target key start
LH: loop header
LB: loop body
LE: loop exit
PB: predicated region body
PF: predicated region fallthrough
CT: control target
= control target key end

     0   :  { %8 = vsyncpa [#allocation4], 0  ;;  %s2873_s0 = inlined_call_operand.hbm [shape: f32[128,128], index: 0, kind: input, shape index: {}]   ;;  %s2874_s1 = inlined_call_operand.hbm [shape: f32[128,128], index: 1, kind: input, shape index: {}]   ;;  %s2875_s2 = inlined_call_operand.vmem [shape: f32[1,128], index: 2, kind: input, shape index: {}]   ;;  %s2876_s3 = inlined_call_operand.hbm [shape: f32[128,128], index: 3, kind: output, shape index: {}]  }
   0x1   :  { %9 = vsyncpa [#allocation7], 0 }
   0x2   :  { %10 = vsyncpa [#allocation5], 0  ;;  %s2105_s12 = smov [#allocation3]  }
   0x3   :  { %s16_s13 = sshll.u32 %s2105_s12, 4  ;;  %s17_s13 = int_to_ptr.vmem [resolvable:$true] %s16_s13 }
   0x4   :  { %s2047_s14 = scalar_lea.vmem %s17_s13, 2048  ;;  %p2052_p1 = scmp.lt.s32.totalorder %s17_s13, %s17_s13 }
   0x5   :  { %p2048_p0 = scmp.ne.s32.totalorder %s17_s13, %s2047_s14  ;;  %p2053_p2 = scmp.lt.s32.totalorder %s2047_s14, %s2047_s14 }
   0x7   :  { %p2054_p3 = por %p2053_p2, %p2052_p1 }
   0x9   :  { %p2055_p4 = pnand %p2054_p3, %p2048_p0 }
   0xb   :  { %2058 = shalt.err (!%p2055_p4)
}
   0xc   :  { %s2106_s15 = smov 128   ;;  %s2107_s16 = smov 8  }
   0xd   :  { %22 = dma.hbm_to_vmem [thread:$0]  %s2873_s0, 2048, %s17_s13, [#allocation4], %s2106_s15, %s2106_s15, %s2107_s16  }
   0xe   :  { %s2108_s19 = smov [#allocation6]  }
   0xf   :  { %s28_s20 = sshll.u32 %s2108_s19, 4  ;;  %s29_s20 = int_to_ptr.vmem [resolvable:$true] %s28_s20 }
  0x10   :  { %s2067_s21 = scalar_lea.vmem %s29_s20, 2048  ;;  %p2072_p6 = scmp.lt.s32.totalorder %s29_s20, %s29_s20 }
  0x11   :  { %p2068_p5 = scmp.ne.s32.totalorder %s29_s20, %s2067_s21  ;;  %p2073_p7 = scmp.lt.s32.totalorder %s2067_s21, %s2067_s21 }
  0x13   :  { %p2074_p8 = por %p2073_p7, %p2072_p6 }
  0x15   :  { %p2075_p9 = pnand %p2074_p8, %p2068_p5 }
  0x17   :  { %2078 = shalt.err (!%p2075_p9)
}
  0x18   :  { %34 = dma.hbm_to_vmem [thread:$0]  %s2874_s1, 2048, %s29_s20, [#allocation7], %s2106_s15, %s2106_s15, %s2107_s16  }
  0x19   :  { %2099 = dma.done.wait [#allocation4], 2048  }
  0x1a   :  { %2100 = vsyncadd [#allocation4], 4294965248 }
  0x1b   :  { %2101 = dma.done.wait [#allocation7], 2048  }
  0x1c   :  { %2102 = vsyncadd [#allocation7], 4294965248  ;;  %v110_v0 = vld [vmem:[#allocation6 + $0x78] sm:$0xff]  ;;  %v109_v1 = vld [vmem:[#allocation6 + $0x70] sm:$0xff] }
  0x1d   :  { %v108_v2 = vld [vmem:[#allocation6 + $0x68] sm:$0xff]  ;;  %v2142_v3 = vand.u32 4294901760, %v110_v0  ;;  %v2144_v4 = vand.u32 4294901760, %v109_v1  ;;  %v107_v6 = vld [vmem:[#allocation6 + $0x60] sm:$0xff]  ;;  %v106_v7 = vld [vmem:[#allocation6 + $0x58] sm:$0xff] }
  0x1e   :  { %v2146_v5 = vand.u32 4294901760, %v108_v2  ;;  %v105_v8 = vld [vmem:[#allocation6 + $0x50] sm:$0xff]  ;;  %v2148_v9 = vand.u32 4294901760, %v107_v6  ;;  %v2150_v10 = vand.u32 4294901760, %v106_v7  ;;  %v104_v12 = vld [vmem:[#allocation6 + $0x48] sm:$0xff]  ;;  %v103_v13 = vld [vmem:[#allocation6 + $0x40] sm:$0xff] }
  0x1f   :  { %v2152_v11 = vand.u32 4294901760, %v105_v8  ;;  %1698 = vmatprep.subr.mxu0 %v2142_v3  ;;  %v2156_v14 = vsub.f32 %v110_v0, %v2142_v3  ;;  %v2159_v15 = vsub.f32 %v109_v1, %v2144_v4  ;;  %v2161_v16 = vand.u32 4294901760, %v104_v12  ;;  %v102_v18 = vld [vmem:[#allocation6 + $0x38] sm:$0xff]  ;;  %v101_v25 = vld [vmem:[#allocation6 + $0x30] sm:$0xff]  ;;  %v100_v35 = vld [vmem:[#allocation6 + $0x28] sm:$0xff] }
  0x20   :  { %v2164_v17 = vsub.f32 %v108_v2, %v2146_v5  ;;  %1699 = vmatpush3.msra.mxu0 %v2142_v3  ;;  %v2168_v19 = vsub.f32 %v107_v6, %v2148_v9  ;;  %v2171_v20 = vsub.f32 %v106_v7, %v2150_v10  ;;  %v2183_v24 = vand.u32 4294901760, %v103_v13  ;;  %v99_v40 = vld [vmem:[#allocation6 + $0x20] sm:$0xff]  ;;  %v80_v49 = vld [vmem:[#allocation3 + $0x8] sm:$0xff]  ;;  %v98_v53 = vld [vmem:[#allocation6 + $0x18] sm:$0xff] }
  0x21   :  { %1700 = vmatprep.subr.mxu0 %v2144_v4  ;;  %v2175_v21 = vand.u32 4294901760, %v2156_v14  ;;  %v2178_v22 = vand.u32 4294901760, %v2159_v15  ;;  %v2189_v27 = vand.u32 4294901760, %v102_v18  ;;  %v2195_v29 = vsub.f32 %v105_v8, %v2152_v11  ;;  %v79_v47 = vld [vmem:[#allocation3] sm:$0xff]  ;;  %v97_v59 = vld [vmem:[#allocation6 + $0x10] sm:$0xff]  ;;  %v96_v6 = vld [vmem:[#allocation6 + $0x8] sm:$0xff] }
  0x22   :  { %v2181_v23 = vand.u32 4294901760, %v2164_v17  ;;  %1701 = vmatpush3.msra.mxu0 %v2144_v4  ;;  %v2187_v26 = vand.u32 4294901760, %v2168_v19  ;;  %v2192_v28 = vand.u32 4294901760, %v2171_v20  ;;  %v2205_v33 = vsub.f32 %v104_v12, %v2161_v16  ;;  %v81_v63 = vld [vmem:[#allocation3 + $0x10] sm:$0xff] }
  0x23   :  { %2917 = vst [vmem:[#allocation12_spill] sm:$0xff] %v2178_v22  ;;  %1702 = vmatprep.subr.mxu0 %v2146_v5  ;;  %v356_v30 = vsub.f32 %v2156_v14, %v2175_v21  ;;  %v363_v31 = vsub.f32 %v2159_v15, %v2178_v22  ;;  %v2208_v34 = vand.u32 4294901760, %v101_v25  ;;  %v2214_v39 = vand.u32 4294901760, %v2195_v29  ;;  %v88_v22 = vld [vmem:[#allocation3 + $0x48] sm:$0xff] }
  0x24   :  { %2918 = vst [vmem:[#allocation13_spill] sm:$0xff] %v2181_v23  ;;  %2919 = vst [vmem:[#allocation14_spill] sm:$0xff] %v2187_v26  ;;  %v370_v32 = vsub.f32 %v2164_v17, %v2181_v23  ;;  %1703 = vmatpush3.msra.mxu0 %v2146_v5  ;;  %v377_v38 = vsub.f32 %v2168_v19, %v2187_v26  ;;  %v2218_v41 = vand.u32 4294901760, %v2205_v33  ;;  %v2226_v45 = vand.u32 4294901760, %v100_v35 }
  0x25   :  { %2920 = vst [vmem:[#allocation15_spill] sm:$0xff] %v2192_v28  ;;  %1704 = vmatprep.subr.mxu0 %v2148_v9  ;;  %v357_v36 = vand.u32 4294901760, %v356_v30  ;;  %v364_v37 = vand.u32 4294901760, %v363_v31  ;;  %2921 = vst [vmem:[#allocation16_spill] sm:$0xff] %v2214_v39  ;;  %v2221_v42 = vsub.f32 %v103_v13, %v2183_v24  ;;  %v384_v44 = vsub.f32 %v2171_v20, %v2192_v28  ;;  %v95_v31 = vld [vmem:[#allocation6] sm:$0xff] }
  0x26   :  { %1705 = vmatpush3.msra.mxu0 %v2148_v9  ;;  %2922 = vst [vmem:[#allocation17_spill] sm:$0xff] %v2218_v41  ;;  %v371_v43 = vand.u32 4294901760, %v370_v32  ;;  %v2229_v46 = vsub.f32 %v102_v18, %v2189_v27  ;;  %v2232_v48 = vand.u32 4294901760, %v99_v40  ;;  %v378_v50 = vand.u32 4294901760, %v377_v38  ;;  %v82_v18 = vld [vmem:[#allocation3 + $0x18] sm:$0xff] }
  0x27   :  { %1706 = vmatprep.subr.mxu0 %v2150_v10  ;;  %1754 = vmatprep.subr.mxu1 %v357_v36  ;;  %v391_v51 = vsub.f32 %v2195_v29, %v2214_v39  ;;  %v2238_v52 = vand.u32 4294901760, %v2221_v42  ;;  %v2241_v54 = vsub.f32 %v101_v25, %v2208_v34  ;;  %v398_v55 = vsub.f32 %v2205_v33, %v2218_v41  ;;  %v85_v41 = vld [vmem:[#allocation3 + $0x30] sm:$0xff] }
  0x28   :  { %1707 = vmatpush3.msra.mxu0 %v2150_v10  ;;  %1755 = vmatpush3.msra.mxu1 %v357_v36  ;;  %v2246_v56 = vand.u32 4294901760, %v79_v47  ;;  %v385_v57 = vand.u32 4294901760, %v384_v44  ;;  %v2250_v58 = vand.u32 4294901760, %v2229_v46  ;;  %v2253_v60 = vsub.f32 %v100_v35, %v2226_v45 }
  0x29   :  { %1708 = vmatprep.subr.mxu0 %v2152_v11  ;;  %1756 = vmatprep.subr.mxu1 %v364_v37  ;;  %2923 = vst [vmem:[#allocation18_spill] sm:$0xff] %v2238_v52  ;;  %v2255_v61 = vand.u32 4294901760, %v80_v49  ;;  %v2258_v62 = vand.u32 4294901760, %v98_v53  ;;  %v392_v0 = vand.u32 4294901760, %v391_v51  ;;  %v405_v1 = vsub.f32 %v2221_v42, %v2238_v52  ;;  %v86_v52 = vld [vmem:[#allocation3 + $0x38] sm:$0xff] }
  0x2a   :  { %1709 = vmatpush3.msra.mxu0 %v2152_v11  ;;  %1757 = vmatpush3.msra.mxu1 %v364_v37  ;;  %2924 = vst [vmem:[#allocation19_spill] sm:$0xff] %v2250_v58  ;;  %v2264_v2 = vand.u32 4294901760, %v2241_v54  ;;  %v2267_v7 = vsub.f32 %v99_v40, %v2232_v48  ;;  %v399_v8 = vand.u32 4294901760, %v398_v55  ;;  %v2270_v12 = vand.u32 4294901760, %v97_v59 }
  0x2b   :  { %1710 = vmatprep.subr.mxu0 %v2161_v16  ;;  %1758 = vmatprep.subr.mxu1 %v371_v43  ;;  %v2273_v13 = vsub.f32 %v79_v47, %v2246_v56  ;;  %v412_v25 = vsub.f32 %v2229_v46, %v2250_v58  ;;  %v2279_v30 = vand.u32 4294901760, %v2253_v60  ;;  %v2282_v32 = vsub.f32 %v80_v49, %v2255_v61  ;;  %v83_v47 = vld [vmem:[#allocation3 + $0x20] sm:$0xff] }
  0x2c   :  { %1711 = vmatpush3.msra.mxu0 %v2161_v16  ;;  %1759 = vmatpush3.msra.mxu1 %v371_v43  ;;  %2925 = vst [vmem:[#allocation20_spill] sm:$0xff] %v2264_v2  ;;  %v2284_v35 = vand.u32 4294901760, %v81_v63  ;;  %v2287_v36 = vand.u32 4294901760, %v96_v6  ;;  %v2290_v37 = vsub.f32 %v98_v53, %v2258_v62  ;;  %v406_v38 = vand.u32 4294901760, %v405_v1 }
  0x2d   :  { %1712 = vmatprep.subr.mxu0 %v2183_v24  ;;  %1760 = vmatprep.subr.mxu1 %v378_v50  ;;  %2926 = vst [vmem:[#allocation21_spill] sm:$0xff] %v2279_v30  ;;  %v419_v40 = vsub.f32 %v2241_v54, %v2264_v2  ;;  %v2296_v43 = vand.u32 4294901760, %v2267_v7  ;;  %v2298_v44 = vand.u32 4294901760, %v82_v18  ;;  %v2301_v49 = vand.u32 4294901760, %v95_v31 }
  0x2e   :  { %1713 = vmatpush3.msra.mxu0 %v2183_v24  ;;  %1761 = vmatpush3.msra.mxu1 %v378_v50  ;;  %2927 = vst [vmem:[#allocation22_spill] sm:$0xff] %v2287_v36  ;;  %v2305_v51 = vsub.f32 %v97_v59, %v2270_v12  ;;  %v413_v53 = vand.u32 4294901760, %v412_v25  ;;  %v426_v55 = vsub.f32 %v2253_v60, %v2279_v30  ;;  %v2316_v50 = vand.u32 4294901760, %v2290_v37 }
  0x2f   :  { %1714 = vmatprep.subr.mxu0 %v2189_v27  ;;  %1762 = vmatprep.subr.mxu1 %v385_v57  ;;  %2928 = vst [vmem:[#allocation23_spill] sm:$0xff] %v2296_v43  ;;  %2929 = vst [vmem:[#allocation24_spill] sm:$0xff] %v2301_v49  ;;  %v2312_v1 = vsub.f32 %v81_v63, %v2284_v35  ;;  %v2319_v59 = vsub.f32 %v96_v6, %v2287_v36  ;;  %v2321_v2 = vand.u32 4294901760, %v83_v47 }
  0x30   :  { %1715 = vmatpush3.msra.mxu0 %v2189_v27  ;;  %1763 = vmatpush3.msra.mxu1 %v385_v57  ;;  %2931 = vst [vmem:[#allocation26_spill] sm:$0xff] %v2316_v50  ;;  %v420_v25 = vand.u32 4294901760, %v419_v40  ;;  %v433_v63 = vsub.f32 %v2267_v7, %v2296_v43  ;;  %v2327_v57 = vsub.f32 %v82_v18, %v2298_v44  ;;  %v2334_v30 = vand.u32 4294901760, %v2305_v51 }
  0x31   :  { %1716 = vmatprep.subr.mxu0 %v2208_v34  ;;  %1764 = vmatprep.subr.mxu1 %v392_v0  ;;  %2930 = vst [vmem:[#allocation25_spill] sm:$0xff] %v2312_v1  ;;  %v427_v40 = vand.u32 4294901760, %v426_v55  ;;  %v2934_v43 = vand.u32 4294901760, %v2282_v32  ;;  %v2350_v39 = vand.u32 4294901760, %v2319_v59  ;;  %v2353_v55 = vsub.f32 %v83_v47, %v2321_v2 }
  0x32   :  { %1717 = vmatpush3.msra.mxu0 %v2208_v34  ;;  %1765 = vmatpush3.msra.mxu1 %v392_v0  ;;  %v84_v0 = vld [vmem:[#allocation3 + $0x28] sm:$0xff]  ;;  %2933 = vst [vmem:[#allocation27_spill] sm:$0xff] %v2334_v30  ;;  %v2363_v26 = vand.u32 4294901760, %v85_v41 }
  0x33   :  { %1718 = vmatprep.subr.mxu0 %v2226_v45  ;;  %1766 = vmatprep.subr.mxu1 %v399_v8  ;;  %v2336_v58 = vand.u32 4294901760, %v84_v0  ;;  %v205_v18 = vsub.f32 %v2282_v32, %v2934_v43  ;;  %2935 = vst [vmem:[#allocation28_spill] sm:$0xff] %v2350_v39  ;;  %v434_v43 = vand.u32 4294901760, %v433_v63  ;;  %v2936_v63 = vand.u32 4294901760, %v2312_v1 }
  0x34   :  { %1719 = vmatpush3.msra.mxu0 %v2226_v45  ;;  %1767 = vmatpush3.msra.mxu1 %v399_v8  ;;  %v2932_v8 = vand.u32 4294901760, %v2273_v13 }
  0x35   :  { %1720 = vmatprep.subr.mxu0 %v2232_v48  ;;  %1768 = vmatprep.subr.mxu1 %v406_v38  ;;  %v2361_v28 = vsub.f32 %v84_v0, %v2336_v58  ;;  %v206_v47 = vand.u32 4294901760, %v205_v18  ;;  %v454_v0 = vsub.f32 %v2319_v59, %v2350_v39  ;;  %v2937_v18 = vand.u32 4294901760, %v2327_v57 }
  0x36   :  { %1721 = vmatpush3.msra.mxu0 %v2232_v48  ;;  %1769 = vmatpush3.msra.mxu1 %v406_v38  ;;  %v195_v6 = vsub.f32 %v2273_v13, %v2932_v8  ;;  %v2344_v38 = vsub.f32 %v95_v31, %v2301_v49  ;;  %v440_v8 = vsub.f32 %v2290_v37, %v2316_v50 }
  0x37   :  { %1722 = vmatprep.subr.mxu0 %v2258_v62  ;;  %1770 = vmatprep.subr.mxu1 %v413_v53  ;;  %v447_v50 = vsub.f32 %v2305_v51, %v2334_v30  ;;  %v215_v31 = vsub.f32 %v2312_v1, %v2936_v63  ;;  %v2376_v30 = vand.u32 4294901760, %v86_v52  ;;  %v225_v63 = vsub.f32 %v2327_v57, %v2937_v18  ;;  %v87_v1 = vld [vmem:[#allocation3 + $0x40] sm:$0xff] }
  0x38   :  { %1723 = vmatpush3.msra.mxu0 %v2258_v62  ;;  %1771 = vmatpush3.msra.mxu1 %v413_v53  ;;  %v196_v53 = vand.u32 4294901760, %v195_v6  ;;  %v2370_v23 = vand.u32 4294901760, %v2344_v38  ;;  %v2385_v39 = vsub.f32 %v85_v41, %v2363_v26  ;;  %v455_v18 = vand.u32 4294901760, %v454_v0 }
  0x39   :  { %1724 = vmatprep.subr.mxu0 %v2270_v12  ;;  %1772 = vmatprep.subr.mxu1 %v420_v25  ;;  %v216_v6 = vand.u32 4294901760, %v215_v31  ;;  %v2396_v41 = vand.u32 4294901760, %v87_v1  ;;  %v2404_v0 = vand.u32 4294901760, %v88_v22 }
  0x3a   :  { %1725 = vmatpush3.msra.mxu0 %v2270_v12  ;;  %1773 = vmatpush3.msra.mxu1 %v420_v25  ;;  %v441_v25 = vand.u32 4294901760, %v440_v8  ;;  %v2911_v8 = vand.u32 4294901760, %v2361_v28 }
  0x3b   :  { %1726 = vmatprep.subr.mxu0 %v2287_v36  ;;  %1774 = vmatprep.subr.mxu1 %v427_v40 }
  0x3c   :  { %1727 = vmatpush3.msra.mxu0 %v2287_v36  ;;  %1775 = vmatpush3.msra.mxu1 %v427_v40  ;;  %v448_v40 = vand.u32 4294901760, %v447_v50  ;;  %v461_v36 = vsub.f32 %v2344_v38, %v2370_v23  ;;  %v245_v31 = vsub.f32 %v2361_v28, %v2911_v8  ;;  %v90_v8 = vld [vmem:[#allocation3 + $0x58] sm:$0xff] }
  0x3d   :  { %1728 = vmatprep.subr.mxu0 %v2301_v49  ;;  %1776 = vmatprep.subr.mxu1 %v434_v43 }
  0x3e   :  { %1729 = vmatpush3.msra.mxu0 %v2301_v49  ;;  %1730 = vmatprep.mubr.f32.mxu0 %v196_v53  ;;  %v2938_v49 = vand.u32 4294901760, %v2353_v55  ;;  %v2394_v53 = vsub.f32 %v86_v52, %v2376_v30  ;;  %v462_v52 = vand.u32 4294901760, %v461_v36 }
  0x3f   :  { %1777 = vmatpush3.msra.mxu1 %v434_v43  ;;  %1731 = vmatmul.mubr.f32.vlgmr.msra.gmra.mxu0 %v206_v47  ;;  %v226_v43 = vand.u32 4294901760, %v225_v63  ;;  %v2915_v47 = vand.u32 4294901760, %v2385_v39  ;;  %v2409_v63 = vsub.f32 %v87_v1, %v2396_v41 }
  0x40   :  { %1778 = vmatprep.subr.mxu1 %v441_v25  ;;  %1810 = vmatprep.subr.mxu0 %v2156_v14  ;;  %v235_v50 = vsub.f32 %v2353_v55, %v2938_v49  ;;  %v89_v49 = vld [vmem:[#allocation3 + $0x50] sm:$0xff] }
  0x41   :  { %1779 = vmatpush3.msra.mxu1 %v441_v25  ;;  %1811 = vmatpush3.msra.mxu0 %v2156_v14  ;;  %v2913_v25 = vand.u32 4294901760, %v2394_v53  ;;  %v255_v36 = vsub.f32 %v2385_v39, %v2915_v47 }
  0x42   :  { %1780 = vmatprep.subr.mxu1 %v448_v40  ;;  %1812 = vmatprep.subr.mxu0 %v2159_v15  ;;  %v236_v14 = vand.u32 4294901760, %v235_v50 }
  0x43   :  { %1733 = vmatprep.mubr.f32.mxu0 %v216_v6  ;;  %1781 = vmatpush3.msra.mxu1 %v448_v40  ;;  %v246_v6 = vand.u32 4294901760, %v245_v31  ;;  %v2419_v40 = vand.u32 4294901760, %v89_v49  ;;  %v265_v1 = vsub.f32 %v2394_v53, %v2913_v25  ;;  %v256_v50 = vand.u32 4294901760, %v255_v36 }
  0x44   :  { %1813 = vmatpush3.msra.mxu0 %v2159_v15  ;;  %1782 = vmatprep.subr.mxu1 %v455_v18  ;;  %v2417_v15 = vsub.f32 %v88_v22, %v2404_v0  ;;  %v91_v22 = vld [vmem:[#allocation3 + $0x60] sm:$0xff] }
  0x45   :  { %1734 = vmatmul.mubr.f32.gmra.mxu0 %v226_v43  ;;  %1814 = vmatprep.subr.mxu0 %v2164_v17  ;;  %v2433_v31 = vsub.f32 %v89_v49, %v2419_v40  ;;  %v2445_v36 = vand.u32 4294901760, %v91_v22 }
  0x46   :  { %1783 = vmatpush3.msra.mxu1 %v455_v18  ;;  %1815 = vmatpush3.msra.mxu0 %v2164_v17  ;;  %v2912_v17 = vand.u32 4294901760, %v2409_v63  ;;  %v2426_v18 = vand.u32 4294901760, %v90_v8  ;;  %v2914_v43 = vand.u32 4294901760, %v2417_v15 }
  0x47   :  { %1784 = vmatprep.subr.mxu1 %v462_v52  ;;  %1816 = vmatprep.subr.mxu0 %v2168_v19  ;;  %v2916_v49 = vand.u32 4294901760, %v2433_v31  ;;  %v2461_v25 = vsub.f32 %v91_v22, %v2445_v36 }
  0x48   :  { %1736 = vmatprep.mubr.f32.mxu0 %v236_v14  ;;  %1785 = vmatpush3.msra.mxu1 %v462_v52  ;;  %v92_v52 = vld [vmem:[#allocation3 + $0x68] sm:$0xff]  ;;  %v275_v14 = vsub.f32 %v2409_v63, %v2912_v17 }
  0x49   :  { %1786 = vmatprep.mubr.f32.mxu1 %v2246_v56  ;;  %1817 = vmatpush3.msra.mxu0 %v2168_v19  ;;  %v266_v19 = vand.u32 4294901760, %v265_v1  ;;  %v2454_v1 = vand.u32 4294901760, %v92_v52  ;;  %v314_v22 = vand.u32 4294901760, %v2461_v25 }
  0x4a   :  { %1737 = vmatmul.mubr.f32.gmra.mxu0 %v246_v6  ;;  %1787 = vmatmul.mubr.f32.vlgmr.msra.gmra.mxu1 %v2255_v61  ;;  %v2443_v6 = vsub.f32 %v90_v8, %v2426_v18  ;;  %v93_v8 = vld [vmem:[#allocation3 + $0x70] sm:$0xff]  ;;  %v276_v17 = vand.u32 4294901760, %v275_v14 }
  0x4b   :  { %1818 = vmatprep.subr.mxu0 %v2171_v20  ;;  %1866 = vmatprep.subr.mxu1 %v2142_v3  ;;  %v2471_v14 = vsub.f32 %v92_v52, %v2454_v1  ;;  %v2473_v47 = vand.u32 4294901760, %v93_v8 }
  0x4c   :  { %1819 = vmatpush3.msra.mxu0 %v2171_v20  ;;  %1867 = vmatpush3.msra.mxu1 %v2142_v3  ;;  %v285_v20 = vsub.f32 %v2417_v15, %v2914_v43  ;;  %v94_v43 = vld [vmem:[#allocation3 + $0x78] sm:$0xff] }
  0x4d   :  { %1820 = vmatprep.subr.mxu0 %v2195_v29  ;;  %1868 = vmatprep.subr.mxu1 %v2144_v4 }
  0x4e   :  { %1739 = vmatprep.mubr.f32.mxu0 %v256_v50  ;;  %1789 = vmatprep.mubr.f32.mxu1 %v2284_v35  ;;  %v304_v50 = vand.u32 4294901760, %v2443_v6 }
  0x4f   :  { %1821 = vmatpush3.msra.mxu0 %v2195_v29  ;;  %1869 = vmatpush3.msra.mxu1 %v2144_v4  ;;  %v286_v29 = vand.u32 4294901760, %v285_v20  ;;  %v2482_v20 = vand.u32 4294901760, %v94_v43 }
  0x50   :  { %1740 = vmatmul.mubr.f32.gmra.mxu0 %v266_v19  ;;  %1790 = vmatmul.mubr.f32.gmra.mxu1 %v2298_v44  ;;  %v295_v19 = vsub.f32 %v2433_v31, %v2916_v49  ;;  %v2489_v49 = vsub.f32 %v93_v8, %v2473_v47 }
  0x51   :  { %1822 = vmatprep.subr.mxu0 %v2205_v33  ;;  %1870 = vmatprep.subr.mxu1 %v2146_v5 }
  0x52   :  { %1823 = vmatpush3.msra.mxu0 %v2205_v33  ;;  %1871 = vmatpush3.msra.mxu1 %v2146_v5  ;;  %v305_v33 = vsub.f32 %v2443_v6, %v304_v50  ;;  %v296_v52 = vand.u32 4294901760, %v295_v19  ;;  %v2499_v19 = vsub.f32 %v94_v43, %v2482_v20  ;;  %v334_v8 = vand.u32 4294901760, %v2489_v49 }
  0x53   :  { %1824 = vmatprep.subr.mxu0 %v2221_v42  ;;  %1872 = vmatprep.subr.mxu1 %v2148_v9 }
  0x54   :  { %1742 = vmatprep.mubr.f32.mxu0 %v276_v17  ;;  %1792 = vmatprep.mubr.f32.mxu1 %v2321_v2  ;;  %v324_v17 = vand.u32 4294901760, %v2471_v14 }
  0x55   :  { %1825 = vmatpush3.msra.mxu0 %v2221_v42  ;;  %1873 = vmatpush3.msra.mxu1 %v2148_v9  ;;  %v306_v42 = vand.u32 4294901760, %v305_v33  ;;  %v344_v33 = vand.u32 4294901760, %v2499_v19 }
  0x56   :  { %1743 = vmatmul.mubr.f32.gmra.mxu0 %v286_v29  ;;  %1793 = vmatmul.mubr.f32.gmra.mxu1 %v2336_v58  ;;  %v315_v29 = vsub.f32 %v2461_v25, %v314_v22 }
  0x57   :  { %1826 = vmatprep.subr.mxu0 %v2229_v46  ;;  %1874 = vmatprep.subr.mxu1 %v2150_v10 }
  0x58   :  { %1827 = vmatpush3.msra.mxu0 %v2229_v46  ;;  %1875 = vmatpush3.msra.mxu1 %v2150_v10  ;;  %v325_v46 = vsub.f32 %v2471_v14, %v324_v17  ;;  %v316_v43 = vand.u32 4294901760, %v315_v29 }
  0x59   :  { %1828 = vmatprep.subr.mxu0 %v2241_v54  ;;  %1876 = vmatprep.subr.mxu1 %v2152_v11 }
  0x5a   :  { %1745 = vmatprep.mubr.f32.mxu0 %v296_v52  ;;  %1795 = vmatprep.mubr.f32.mxu1 %v2363_v26  ;;  %v326_v52 = vand.u32 4294901760, %v325_v46  ;;  %v2945_v46 = vand.u32 4294901760, %v2273_v13 }
  0x5b   :  { %1829 = vmatpush3.msra.mxu0 %v2241_v54  ;;  %1877 = vmatpush3.msra.mxu1 %v2152_v11  ;;  %v335_v54 = vsub.f32 %v2489_v49, %v334_v8 }
  0x5c   :  { %1746 = vmatmul.mubr.f32.gmra.mxu0 %v306_v42  ;;  %1796 = vmatmul.mubr.f32.gmra.mxu1 %v2376_v30  ;;  %v345_v42 = vsub.f32 %v2499_v19, %v344_v33 }
  0x5d   :  { %1830 = vmatprep.subr.mxu0 %v2253_v60  ;;  %1878 = vmatprep.subr.mxu1 %v2161_v16 }
  0x5e   :  { %1831 = vmatpush3.msra.mxu0 %v2253_v60  ;;  %1879 = vmatpush3.msra.mxu1 %v2161_v16  ;;  %v336_v60 = vand.u32 4294901760, %v335_v54  ;;  %v346_v29 = vand.u32 4294901760, %v345_v42  ;;  %v2948_v54 = vld [vmem:[#allocation16_spill] sm:$0xff]  ;;  %v2951_v42 = vld [vmem:[#allocation17_spill] sm:$0xff] }
  0x5f   :  { %1832 = vmatprep.subr.mxu0 %v2267_v7  ;;  %1880 = vmatprep.subr.mxu1 %v2183_v24 }
  0x60   :  { %1748 = vmatprep.mubr.f32.mxu0 %v316_v43  ;;  %1798 = vmatprep.mubr.f32.mxu1 %v2396_v41  ;;  %v2946_v43 = vand.u32 4294901760, %v2282_v32 }
  0x61   :  { %1833 = vmatpush3.msra.mxu0 %v2267_v7  ;;  %1881 = vmatpush3.msra.mxu1 %v2183_v24  ;;  %v2939_v7 = vld [vmem:[#allocation12_spill] sm:$0xff] }
  0x62   :  { %1749 = vmatmul.mubr.f32.gmra.mxu0 %v326_v52  ;;  %1799 = vmatmul.mubr.f32.gmra.mxu1 %v2404_v0  ;;  %v2947_v52 = vld [vmem:[#allocation15_spill] sm:$0xff] }
  0x63   :  { %1834 = vmatprep.subr.mxu0 %v2290_v37  ;;  %1882 = vmatprep.subr.mxu1 %v2189_v27 }
  0x64   :  { %1835 = vmatpush3.msra.mxu0 %v2290_v37  ;;  %1883 = vmatpush3.msra.mxu1 %v2189_v27  ;;  %v2940_v37 = vld [vmem:[#allocation25_spill] sm:$0xff] }
  0x65   :  { %1836 = vmatprep.subr.mxu0 %v2305_v51  ;;  %1884 = vmatprep.subr.mxu1 %v2208_v34 }
  0x66   :  { %1751 = vmatprep.mubr.f32.mxu0 %v336_v60  ;;  %1801 = vmatprep.mubr.f32.mxu1 %v2419_v40  ;;  %v2955_v60 = vld [vmem:[#allocation19_spill] sm:$0xff] }
  0x67   :  { %1837 = vmatpush3.msra.mxu0 %v2305_v51  ;;  %1885 = vmatpush3.msra.mxu1 %v2208_v34  ;;  %v2941_v51 = vld [vmem:[#allocation22_spill] sm:$0xff] }
  0x68   :  { %1752 = vmatmul.mubr.f32.gmra.mxu0 %v346_v29  ;;  %1802 = vmatmul.mubr.f32.gmra.mxu1 %v2426_v18 }
  0x69   :  { %1838 = vmatprep.subr.mxu0 %v2319_v59  ;;  %1886 = vmatprep.subr.mxu1 %v2226_v45 }
  0x6a   :  { %1839 = vmatpush3.msra.mxu0 %v2319_v59  ;;  %1887 = vmatpush3.msra.mxu1 %v2226_v45  ;;  %v2942_v59 = vld [vmem:[#allocation13_spill] sm:$0xff] }
  0x6b   :  { %1840 = vmatprep.subr.mxu0 %v2344_v38  ;;  %1888 = vmatprep.subr.mxu1 %v2232_v48 }
  0x6c   :  { %1804 = vmatprep.mubr.f32.mxu1 %v2445_v36  ;;  %1841 = vmatpush3.msra.mxu0 %v2344_v38  ;;  %v2944_v38 = vld [vmem:[#allocation14_spill] sm:$0xff] }
  0x6d   :  { %1842 = vmatprep.mubr.f32.mxu0 %v2273_v13  ;;  %1889 = vmatpush3.msra.mxu1 %v2232_v48  ;;  %v2949_v13 = vand.u32 4294901760, %v2940_v37 }
  0x6e   :  { %1805 = vmatmul.mubr.f32.gmra.mxu1 %v2454_v1  ;;  %1843 = vmatmul.mubr.f32.vlgmr.msra.gmra.mxu0 %v2282_v32  ;;  %v2950_v32 = vand.u32 4294901760, %v2327_v57 }
  0x6f   :  { %1890 = vmatprep.subr.mxu1 %v2258_v62  ;;  %1922 = vmatprep.subr.mxu0 %v2175_v21 }
  0x70   :  { %1891 = vmatpush3.msra.mxu1 %v2258_v62  ;;  %1923 = vmatpush3.msra.mxu0 %v2175_v21  ;;  %v2943_v21 = vld [vmem:[#allocation24_spill] sm:$0xff] }
  0x71   :  { %1892 = vmatprep.subr.mxu1 %v2270_v12  ;;  %1924 = vmatprep.subr.mxu0 %v2939_v7 }
  0x72   :  { %1807 = vmatprep.mubr.f32.mxu1 %v2473_v47  ;;  %1845 = vmatprep.mubr.f32.mxu0 %v2940_v37 }
  0x73   :  { %1893 = vmatpush3.msra.mxu1 %v2270_v12  ;;  %1925 = vmatpush3.msra.mxu0 %v2939_v7 }
  0x74   :  { %1808 = vmatmul.mubr.f32.gmra.mxu1 %v2482_v20  ;;  %1846 = vmatmul.mubr.f32.gmra.mxu0 %v2327_v57  ;;  %v2954_v57 = vand.u32 4294901760, %v2361_v28 }
  0x75   :  { %1894 = vmatprep.subr.mxu1 %v2941_v51  ;;  %1926 = vmatprep.subr.mxu0 %v2942_v59 }
  0x76   :  { %1895 = vmatpush3.msra.mxu1 %v2941_v51  ;;  %1927 = vmatpush3.msra.mxu0 %v2942_v59 }
  0x77   :  { %1896 = vmatprep.subr.mxu1 %v2943_v21  ;;  %1928 = vmatprep.subr.mxu0 %v2944_v38 }
  0x78   :  { %1848 = vmatprep.mubr.f32.mxu0 %v2353_v55  ;;  %1897 = vmatpush3.msra.mxu1 %v2943_v21 }
  0x79   :  { %1898 = vmatprep.mubr.f32.mxu1 %v2945_v46  ;;  %1929 = vmatpush3.msra.mxu0 %v2944_v38 }
  0x7a   :  { %1849 = vmatmul.mubr.f32.gmra.mxu0 %v2361_v28  ;;  %1899 = vmatmul.mubr.f32.vlgmr.msra.gmra.mxu1 %v2946_v43  ;;  %v2958_v28 = vand.u32 4294901760, %v2394_v53 }
  0x7b   :  { %1930 = vmatprep.subr.mxu0 %v2947_v52  ;;  %1978 = vmatprep.subr.mxu1 %v2142_v3 }
  0x7c   :  { %1931 = vmatpush3.msra.mxu0 %v2947_v52  ;;  %1979 = vmatpush3.msra.mxu1 %v2142_v3  ;;  %v2952_v3 = vld [vmem:[#allocation18_spill] sm:$0xff] }
  0x7d   :  { %1932 = vmatprep.subr.mxu0 %v2948_v54  ;;  %1980 = vmatprep.subr.mxu1 %v2144_v4 }
  0x7e   :  { %1851 = vmatprep.mubr.f32.mxu0 %v2385_v39  ;;  %1901 = vmatprep.mubr.f32.mxu1 %v2949_v13 }
  0x7f   :  { %1933 = vmatpush3.msra.mxu0 %v2948_v54  ;;  %1981 = vmatpush3.msra.mxu1 %v2144_v4  ;;  %v2953_v4 = vand.u32 4294901760, %v2353_v55  ;;  %v2959_v55 = vld [vmem:[#allocation21_spill] sm:$0xff] }
  0x80   :  { %1852 = vmatmul.mubr.f32.gmra.mxu0 %v2394_v53  ;;  %1902 = vmatmul.mubr.f32.gmra.mxu1 %v2950_v32  ;;  %v2963_v53 = vld [vmem:[#allocation26_spill] sm:$0xff] }
  0x81   :  { %1934 = vmatprep.subr.mxu0 %v2951_v42  ;;  %1982 = vmatprep.subr.mxu1 %v2146_v5 }
  0x82   :  { %1935 = vmatpush3.msra.mxu0 %v2951_v42  ;;  %1983 = vmatpush3.msra.mxu1 %v2146_v5  ;;  %v2956_v5 = vld [vmem:[#allocation20_spill] sm:$0xff] }
  0x83   :  { %1936 = vmatprep.subr.mxu0 %v2952_v3  ;;  %1984 = vmatprep.subr.mxu1 %v2148_v9 }
  0x84   :  { %1854 = vmatprep.mubr.f32.mxu0 %v2409_v63  ;;  %1904 = vmatprep.mubr.f32.mxu1 %v2953_v4 }
  0x85   :  { %1937 = vmatpush3.msra.mxu0 %v2952_v3  ;;  %1985 = vmatpush3.msra.mxu1 %v2148_v9  ;;  %v2957_v9 = vand.u32 4294901760, %v2385_v39  ;;  %v2962_v39 = vand.u32 4294901760, %v2417_v15 }
  0x86   :  { %1855 = vmatmul.mubr.f32.gmra.mxu0 %v2417_v15  ;;  %1905 = vmatmul.mubr.f32.gmra.mxu1 %v2954_v57 }
  0x87   :  { %1938 = vmatprep.subr.mxu0 %v2955_v60  ;;  %1986 = vmatprep.subr.mxu1 %v2150_v10 }
  0x88   :  { %1939 = vmatpush3.msra.mxu0 %v2955_v60  ;;  %1987 = vmatpush3.msra.mxu1 %v2150_v10  ;;  %v2960_v10 = vld [vmem:[#allocation23_spill] sm:$0xff] }
  0x89   :  { %1940 = vmatprep.subr.mxu0 %v2956_v5  ;;  %1988 = vmatprep.subr.mxu1 %v2152_v11 }
  0x8a   :  { %1857 = vmatprep.mubr.f32.mxu0 %v2433_v31  ;;  %1907 = vmatprep.mubr.f32.mxu1 %v2957_v9 }
  0x8b   :  { %1941 = vmatpush3.msra.mxu0 %v2956_v5  ;;  %1989 = vmatpush3.msra.mxu1 %v2152_v11  ;;  %v2961_v11 = vand.u32 4294901760, %v2409_v63  ;;  %v2966_v63 = vld [vmem:[#allocation28_spill] sm:$0xff] }
  0x8c   :  { %1858 = vmatmul.mubr.f32.gmra.mxu0 %v2443_v6  ;;  %1908 = vmatmul.mubr.f32.gmra.mxu1 %v2958_v28 }
  0x8d   :  { %1942 = vmatprep.subr.mxu0 %v2959_v55  ;;  %1990 = vmatprep.subr.mxu1 %v2161_v16 }
  0x8e   :  { %1943 = vmatpush3.msra.mxu0 %v2959_v55  ;;  %1991 = vmatpush3.msra.mxu1 %v2161_v16  ;;  %v2964_v16 = vld [vmem:[#allocation27_spill] sm:$0xff] }
  0x8f   :  { %1944 = vmatprep.subr.mxu0 %v2960_v10  ;;  %1992 = vmatprep.subr.mxu1 %v2183_v24 }
  0x90   :  { %1860 = vmatprep.mubr.f32.mxu0 %v2461_v25  ;;  %1910 = vmatprep.mubr.f32.mxu1 %v2961_v11 }
  0x91   :  { %1945 = vmatpush3.msra.mxu0 %v2960_v10  ;;  %1993 = vmatpush3.msra.mxu1 %v2183_v24  ;;  %v2965_v24 = vand.u32 4294901760, %v2433_v31 }
  0x92   :  { %1861 = vmatmul.mubr.f32.gmra.mxu0 %v2471_v14  ;;  %1911 = vmatmul.mubr.f32.gmra.mxu1 %v2962_v39 }
  0x93   :  { %1946 = vmatprep.subr.mxu0 %v2963_v53  ;;  %1994 = vmatprep.subr.mxu1 %v2189_v27 }
  0x94   :  { %1947 = vmatpush3.msra.mxu0 %v2963_v53  ;;  %1995 = vmatpush3.msra.mxu1 %v2189_v27 }
  0x95   :  { %1948 = vmatprep.subr.mxu0 %v2964_v16  ;;  %1996 = vmatprep.subr.mxu1 %v2208_v34 }
  0x96   :  { %1863 = vmatprep.mubr.f32.mxu0 %v2489_v49  ;;  %1913 = vmatprep.mubr.f32.mxu1 %v2965_v24 }
  0x97   :  { %1949 = vmatpush3.msra.mxu0 %v2964_v16  ;;  %1997 = vmatpush3.msra.mxu1 %v2208_v34 }
  0x98   :  { %1864 = vmatmul.mubr.f32.gmra.mxu0 %v2499_v19  ;;  %1914 = vmatmul.mubr.f32.gmra.mxu1 %v304_v50 }
  0x99   :  { %1950 = vmatprep.subr.mxu0 %v2966_v63  ;;  %1998 = vmatprep.subr.mxu1 %v2226_v45 }
  0x9a   :  { %1951 = vmatpush3.msra.mxu0 %v2966_v63  ;;  %1999 = vmatpush3.msra.mxu1 %v2226_v45 }
  0x9b   :  { %1952 = vmatprep.subr.mxu0 %v2370_v23  ;;  %2000 = vmatprep.subr.mxu1 %v2232_v48 }
  0x9c   :  { %1916 = vmatprep.mubr.f32.mxu1 %v314_v22  ;;  %1953 = vmatpush3.msra.mxu0 %v2370_v23 }
  0x9d   :  { %1954 = vmatprep.mubr.f32.mxu0 %v2246_v56  ;;  %2001 = vmatpush3.msra.mxu1 %v2232_v48 }
  0x9e   :  { %1917 = vmatmul.mubr.f32.gmra.mxu1 %v324_v17  ;;  %1955 = vmatmul.mubr.f32.vlgmr.msra.gmra.mxu0 %v2255_v61 }
  0x9f   :  { %2002 = vmatprep.subr.mxu1 %v2258_v62  ;;  %1919 = vmatprep.mubr.f32.mxu1 %v334_v8 }
  0xa0   :  { %2003 = vmatpush3.msra.mxu1 %v2258_v62  ;;  %1957 = vmatprep.mubr.f32.mxu0 %v2284_v35 }
  0xa1   :  { %2004 = vmatprep.subr.mxu1 %v2270_v12 }
  0xa2   :  { %2005 = vmatpush3.msra.mxu1 %v2270_v12  ;;  %1958 = vmatmul.mubr.f32.gmra.mxu0 %v2298_v44 }
  0xa3   :  { %1920 = vmatmul.mubr.f32.gmra.mxu1 %v344_v33  ;;  %2006 = vmatprep.subr.mxu1 %v2941_v51 }
  0xa4   :  { %2007 = vmatpush3.msra.mxu1 %v2941_v51  ;;  %1960 = vmatprep.mubr.f32.mxu0 %v2321_v2 }
  0xa5   :  { %2008 = vmatprep.subr.mxu1 %v2943_v21  ;;  %2010 = vmatprep.mubr.f32.mxu1 %v2246_v56 }
  0xa6   :  { %2009 = vmatpush3.msra.mxu1 %v2943_v21  ;;  %1961 = vmatmul.mubr.f32.gmra.mxu0 %v2336_v58 }
  0xa7   :  { %2011 = vmatmul.mubr.f32.vlgmr.msra.gmra.mxu1 %v2255_v61  ;;  %1963 = vmatprep.mubr.f32.mxu0 %v2363_v26 }
  0xa8   :  { %2013 = vmatprep.mubr.f32.mxu1 %v2284_v35 }
  0xaa   :  { %1964 = vmatmul.mubr.f32.gmra.mxu0 %v2376_v30 }
  0xab   :  { %2014 = vmatmul.mubr.f32.gmra.mxu1 %v2298_v44  ;;  %1966 = vmatprep.mubr.f32.mxu0 %v2396_v41 }
  0xac   :  { %2016 = vmatprep.mubr.f32.mxu1 %v2321_v2 }
  0xae   :  { %1967 = vmatmul.mubr.f32.gmra.mxu0 %v2404_v0 }
  0xaf   :  { %2017 = vmatmul.mubr.f32.gmra.mxu1 %v2336_v58  ;;  %1969 = vmatprep.mubr.f32.mxu0 %v2419_v40 }
  0xb0   :  { %2019 = vmatprep.mubr.f32.mxu1 %v2363_v26 }
  0xb2   :  { %1970 = vmatmul.mubr.f32.gmra.mxu0 %v2426_v18 }
  0xb3   :  { %2020 = vmatmul.mubr.f32.gmra.mxu1 %v2376_v30  ;;  %1972 = vmatprep.mubr.f32.mxu0 %v2445_v36 }
  0xb4   :  { %2022 = vmatprep.mubr.f32.mxu1 %v2396_v41 }
  0xb6   :  { %1973 = vmatmul.mubr.f32.gmra.mxu0 %v2454_v1 }
  0xb7   :  { %2023 = vmatmul.mubr.f32.gmra.mxu1 %v2404_v0  ;;  %1975 = vmatprep.mubr.f32.mxu0 %v2473_v47 }
  0xb8   :  { %2025 = vmatprep.mubr.f32.mxu1 %v2419_v40 }
  0xba   :  { %1976 = vmatmul.mubr.f32.gmra.mxu0 %v2482_v20 }
  0xbb   :  { %2026 = vmatmul.mubr.f32.gmra.mxu1 %v2426_v18 }
  0xbc   :  { %2028 = vmatprep.mubr.f32.mxu1 %v2445_v36 }
  0xbf   :  { %2029 = vmatmul.mubr.f32.gmra.mxu1 %v2454_v1 }
  0xc0   :  { %2031 = vmatprep.mubr.f32.mxu1 %v2473_v47 }
  0xc3   :  { %2032 = vmatmul.mubr.f32.gmra.mxu1 %v2482_v20 }
  0xff   :  { %v1732_v23 = vpop.f32.mrf.mxu0 }
 0x101   :  { %v2702_v26 = vpop.f32.mrf.mxu0 }
 0x105   :  { %v2704_v27 = vpop.f32.mrf.mxu0 }
 0x107   :  { %v2706_v34 = vpop.f32.mrf.mxu0 }
 0x10a   :  { %v2708_v45 = vpop.f32.mrf.mxu0  ;;  %v1788_v48 = vpop.f32.mrf.mxu1 }
 0x10b   :  { %v506_v24 = vadd.f32 %v1788_v48, %v1732_v23 }
 0x10c   :  { %v2710_v56 = vpop.f32.mrf.mxu0  ;;  %v499_v58 = vpop.f32.mrf.mxu1 }
 0x110   :  { %v2712_v61 = vpop.f32.mrf.mxu0  ;;  %v1791_v62 = vpop.f32.mrf.mxu1 }
 0x112   :  { %v2714_v2 = vpop.f32.mrf.mxu0  ;;  %v2716_v12 = vpop.f32.mrf.mxu1 }
 0x116   :  { %v2718_v30 = vpop.f32.mrf.mxu0  ;;  %v2720_v35 = vpop.f32.mrf.mxu1 }
 0x118   :  { %v2722_v44 = vpop.f32.mrf.mxu0  ;;  %v2724_v41 = vpop.f32.mrf.mxu1 }
 0x11c   :  { %v2726_v47 = vpop.f32.mrf.mxu0  ;;  %v2728_v0 = vpop.f32.mrf.mxu1 }
 0x11e   :  { %v2730_v25 = vpop.f32.mrf.mxu0  ;;  %v2732_v15 = vpop.f32.mrf.mxu1 }
 0x122   :  { %v2734_v40 = vpop.f32.mrf.mxu0  ;;  %v2736_v18 = vpop.f32.mrf.mxu1 }
 0x124   :  { %v2738_v31 = vpop.f32.mrf.mxu0  ;;  %v2740_v6 = vpop.f32.mrf.mxu1 }
 0x125   :  { %2967 = vst [vmem:[#allocation12_spill] sm:$0xff] %v2738_v31 }
 0x128   :  { %v2742_v36 = vpop.f32.mrf.mxu0  ;;  %v2744_v49 = vpop.f32.mrf.mxu1 }
 0x129   :  { %2968 = vst [vmem:[#allocation25_spill] sm:$0xff] %v2742_v36 }
 0x12a   :  { %v2746_v1 = vpop.f32.mrf.mxu0  ;;  %v2748_v50 = vpop.f32.mrf.mxu1 }
 0x12b   :  { %2969 = vst [vmem:[#allocation22_spill] sm:$0xff] %v2746_v1  ;;  %v500_v1 = vadd.f32 %v499_v58, %v2702_v26  ;;  %v530_v26 = vadd.f32 %v2720_v35, %v2708_v45 }
 0x12e   :  { %v2750_v14 = vpop.f32.mrf.mxu1  ;;  %v1844_v22 = vpop.f32.mrf.mxu0 }
 0x130   :  { %v2752_v20 = vpop.f32.mrf.mxu1  ;;  %v693_v17 = vpop.f32.mrf.mxu0 }
 0x131   :  { %2970 = vst [vmem:[#allocation13_spill] sm:$0xff] %v2752_v20 }
 0x134   :  { %v2754_v19 = vpop.f32.mrf.mxu1  ;;  %v1847_v8 = vpop.f32.mrf.mxu0 }
 0x135   :  { %2971 = vst [vmem:[#allocation24_spill] sm:$0xff] %v2754_v19 }
 0x136   :  { %v2756_v33 = vpop.f32.mrf.mxu1  ;;  %v707_v29 = vpop.f32.mrf.mxu0 }
 0x137   :  { %2972 = vst [vmem:[#allocation14_spill] sm:$0xff] %v2756_v33 }
 0x13a   :  { %v1850_v7 = vpop.f32.mrf.mxu0  ;;  %v1900_v37 = vpop.f32.mrf.mxu1 }
 0x13c   :  { %v721_v51 = vpop.f32.mrf.mxu0  ;;  %v887_v59 = vpop.f32.mrf.mxu1 }
 0x140   :  { %v2758_v21 = vpop.f32.mrf.mxu0  ;;  %v1903_v38 = vpop.f32.mrf.mxu1 }
 0x142   :  { %v2760_v46 = vpop.f32.mrf.mxu0  ;;  %v903_v43 = vpop.f32.mrf.mxu1 }
 0x146   :  { %v2762_v52 = vpop.f32.mrf.mxu0  ;;  %v1906_v54 = vpop.f32.mrf.mxu1 }
 0x148   :  { %v2764_v13 = vpop.f32.mrf.mxu0  ;;  %v919_v32 = vpop.f32.mrf.mxu1 }
 0x14c   :  { %v2766_v42 = vpop.f32.mrf.mxu0  ;;  %v2768_v3 = vpop.f32.mrf.mxu1 }
 0x14e   :  { %v2770_v4 = vpop.f32.mrf.mxu0  ;;  %v2772_v57 = vpop.f32.mrf.mxu1 }
 0x152   :  { %v2774_v60 = vpop.f32.mrf.mxu0  ;;  %v2776_v5 = vpop.f32.mrf.mxu1 }
 0x153   :  { %2973 = vst [vmem:[#allocation15_spill] sm:$0xff] %v2774_v60  ;;  %v694_v60 = vadd.f32 %v693_v17, %v500_v1 }
 0x154   :  { %v2778_v9 = vpop.f32.mrf.mxu0  ;;  %v2780_v28 = vpop.f32.mrf.mxu1 }
 0x155   :  { %2974 = vst [vmem:[#allocation16_spill] sm:$0xff] %v2778_v9  ;;  %v701_v9 = vadd.f32 %v1844_v22, %v506_v24  ;;  %v888_v48 = vadd.f32 %v887_v59, %v694_v60 }
 0x157   :  { %v896_v20 = vadd.f32 %v1900_v37, %v701_v9  ;;  %v542_v9 = vadd.f32 %v2728_v0, %v2712_v61 }
 0x158   :  { %v2782_v55 = vpop.f32.mrf.mxu0  ;;  %v2784_v10 = vpop.f32.mrf.mxu1 }
 0x159   :  { %2975 = vst [vmem:[#allocation17_spill] sm:$0xff] %v2782_v55  ;;  %v518_v55 = vadd.f32 %v1791_v62, %v2704_v27  ;;  %v2807_v27 = vld [vmem:[%s2875_s2] ss:$0 sm:$0xff]  ;;  %s2109_s2 = smov [#allocation8]  }
 0x15a   :  { %v2786_v11 = vpop.f32.mrf.mxu0  ;;  %v2788_v39 = vpop.f32.mrf.mxu1  ;;  %s1492_s24 = sshll.u32 %s2109_s2, 4  ;;  %s1493_s24 = int_to_ptr.vmem [resolvable:$true] %s1492_s24 }
 0x15b   :  { %2976 = vst [vmem:[#allocation18_spill] sm:$0xff] %v2786_v11  ;;  %2977 = vst [vmem:[#allocation19_spill] sm:$0xff] %v2788_v39  ;;  %v715_v23 = vadd.f32 %v1847_v8, %v518_v55  ;;  %s2079_s25 = scalar_lea.vmem %s1493_s24, 2048  ;;  %p2084_p11 = scmp.lt.s32.totalorder %s1493_s24, %s1493_s24 }
 0x15c   :  { %p2080_p10 = scmp.ne.s32.totalorder %s1493_s24, %s2079_s25  ;;  %p2085_p12 = scmp.lt.s32.totalorder %s2079_s25, %s2079_s25 }
 0x15d   :  { %v912_v1 = vadd.f32 %v1903_v38, %v715_v23 }
 0x15e   :  { %v2790_v53 = vpop.f32.mrf.mxu1  ;;  %v1956_v16 = vpop.f32.mrf.mxu0  ;;  %p2086_p13 = por %p2085_p12, %p2084_p11 }
 0x15f   :  { %2978 = vst [vmem:[#allocation20_spill] sm:$0xff] %v2790_v53  ;;  %v512_v53 = vadd.f32 %v2716_v12, %v2706_v34  ;;  %v524_v34 = vadd.f32 %v2724_v41, %v2710_v56  ;;  %v729_v12 = vadd.f32 %v1850_v7, %v530_v26  ;;  %v536_v41 = vadd.f32 %v2732_v15, %v2714_v2 }
 0x160   :  { %v2792_v63 = vpop.f32.mrf.mxu1  ;;  %v1126_v33 = vpop.f32.mrf.mxu0  ;;  %p2087_p0 = pnand %p2086_p13, %p2080_p10 }
 0x161   :  { %2979 = vst [vmem:[#allocation21_spill] sm:$0xff] %v2792_v63  ;;  %v1133_v63 = vadd.f32 %v1956_v16, %v896_v20  ;;  %v708_v62 = vadd.f32 %v707_v29, %v512_v53  ;;  %v1127_v22 = vadd.f32 %v1126_v33, %v888_v48  ;;  %v722_v55 = vadd.f32 %v721_v51, %v524_v34 }
 0x162   :  { %v1959_v19 = vpop.f32.mrf.mxu0  ;;  %v928_v38 = vadd.f32 %v1906_v54, %v729_v12  ;;  %v554_v54 = vadd.f32 %v2736_v18, %v2718_v30 }
 0x163   :  { %v2795_v36 = vpop.f32.mrf.mxu1  ;;  %v904_v8 = vadd.f32 %v903_v43, %v708_v62  ;;  %v1145_v59 = vadd.f32 %v1959_v19, %v912_v1  ;;  %v743_v19 = vadd.f32 %v2758_v21, %v542_v9  ;;  %v920_v43 = vadd.f32 %v919_v32, %v722_v55  ;;  %v2982_v55 = vld [vmem:[#allocation15_spill] sm:$0xff] }
 0x164   :  { %v1138_v11 = vpop.f32.mrf.mxu0  ;;  %v548_v32 = vadd.f32 %v2740_v6, %v2722_v44  ;;  %v566_v62 = vadd.f32 %v2744_v49, %v2726_v47 }
 0x165   :  { %v2798_v31 = vpop.f32.mrf.mxu1  ;;  %v1139_v33 = vadd.f32 %v1138_v11, %v904_v8  ;;  %v736_v11 = vadd.f32 %v2760_v46, %v536_v41  ;;  %v944_v23 = vadd.f32 %v2768_v3, %v743_v19  ;;  %v578_v8 = vadd.f32 %v2750_v14, %v2734_v40  ;;  %v2986_v19 = vld [vmem:[#allocation16_spill] sm:$0xff] }
 0x166   :  { %v1962_v39 = vpop.f32.mrf.mxu0  ;;  %v750_v1 = vadd.f32 %v2764_v13, %v548_v32  ;;  %v771_v34 = vadd.f32 %v2766_v42, %v566_v62 }
 0x167   :  { %v2012_v58 = vpop.f32.mrf.mxu1  ;;  %v1157_v24 = vadd.f32 %v1962_v39, %v928_v38  ;;  %v757_v39 = vadd.f32 %v2762_v52, %v554_v54 }
 0x168   :  { %v1310_v17 = vadd.f32 %v2012_v58, %v1133_v63  ;;  %v1150_v37 = vpop.f32.mrf.mxu0  ;;  %v936_v58 = vadd.f32 %v2772_v57, %v736_v11  ;;  %v2988_v11 = vld [vmem:[#allocation22_spill] sm:$0xff]  ;;  %v2991_v32 = vld [vmem:[#allocation21_spill] sm:$0xff] }
 0x169   :  { %v1303_v20 = vpop.f32.mrf.mxu1  ;;  %v1151_v48 = vadd.f32 %v1150_v37, %v920_v43  ;;  %v560_v37 = vadd.f32 %v2748_v50, %v2730_v25 }
 0x16a   :  { %v1456_v45 = vadd.f32 %v2807_v27, %v1310_v17  ;;  %v1304_v35 = vadd.f32 %v1303_v20, %v1127_v22  ;;  %v1965_v60 = vpop.f32.mrf.mxu0  ;;  %v960_v17 = vadd.f32 %v2776_v5, %v757_v39  ;;  %v952_v20 = vadd.f32 %v2780_v28, %v750_v1  ;;  %v2980_v28 = vld [vmem:[#allocation12_spill] sm:$0xff] }
 0x16b   :  { %v2015_v29 = vpop.f32.mrf.mxu1  ;;  %v1169_v30 = vadd.f32 %v1965_v60, %v944_v23  ;;  %v2981_v60 = vld [vmem:[#allocation13_spill] sm:$0xff] }
 0x16c   :  { %1472 = vst [vmem:[#allocation8 + $0x8] sm:$0xff] %v1456_v45  ;;  %v1455_v53 = vadd.f32 %v2807_v27, %v1304_v35  ;;  %v1322_v16 = vadd.f32 %v2015_v29, %v1145_v59  ;;  %v1162_v56 = vpop.f32.mrf.mxu0  ;;  %v764_v59 = vadd.f32 %v2770_v4, %v560_v37  ;;  %v976_v35 = vadd.f32 %v2784_v10, %v771_v34  ;;  %v2984_v10 = vld [vmem:[#allocation25_spill] sm:$0xff] }
 0x16d   :  { %v1315_v7 = vpop.f32.mrf.mxu1  ;;  %v1163_v44 = vadd.f32 %v1162_v56, %v936_v58  ;;  %v572_v9 = vadd.f32 %v2981_v60, %v2980_v28  ;;  %v785_v29 = vadd.f32 %v2982_v55, %v578_v8  ;;  %v2985_v56 = vld [vmem:[#allocation24_spill] sm:$0xff] }
 0x16e   :  { %1471 = vst [vmem:[#allocation8] sm:$0xff] %v1455_v53  ;;  %v1458_v61 = vadd.f32 %v2807_v27, %v1322_v16  ;;  %v1316_v0 = vadd.f32 %v1315_v7, %v1139_v33  ;;  %v1968_v51 = vpop.f32.mrf.mxu0  ;;  %v2983_v53 = vld [vmem:[#allocation19_spill] sm:$0xff]  ;;  %v590_v41 = vadd.f32 %v2985_v56, %v2984_v10 }
 0x16f   :  { %v2018_v63 = vpop.f32.mrf.mxu1  ;;  %v1181_v47 = vadd.f32 %v1968_v51, %v960_v17  ;;  %v968_v16 = vadd.f32 %v2983_v53, %v764_v59  ;;  %v778_v7 = vadd.f32 %v2986_v19, %v572_v9 }
 0x170   :  { %1474 = vst [vmem:[#allocation8 + $0x18] sm:$0xff] %v1458_v61  ;;  %v1457_v2 = vadd.f32 %v2807_v27, %v1316_v0  ;;  %v1334_v15 = vadd.f32 %v2018_v63, %v1157_v24  ;;  %v1174_v21 = vpop.f32.mrf.mxu0  ;;  %v2987_v24 = vld [vmem:[#allocation20_spill] sm:$0xff]  ;;  %v2989_v63 = vld [vmem:[#allocation14_spill] sm:$0xff] }
 0x171   :  { %v1327_v26 = vpop.f32.mrf.mxu1  ;;  %v1175_v25 = vadd.f32 %v1174_v21, %v952_v20  ;;  %v992_v61 = vadd.f32 %v2987_v24, %v785_v29  ;;  %v584_v23 = vadd.f32 %v2989_v63, %v2988_v11  ;;  %v984_v39 = vadd.f32 %v2991_v32, %v778_v7 }
 0x172   :  { %1473 = vst [vmem:[#allocation8 + $0x10] sm:$0xff] %v1457_v2  ;;  %v1460_v18 = vadd.f32 %v2807_v27, %v1334_v15  ;;  %v1328_v46 = vadd.f32 %v1327_v26, %v1151_v48  ;;  %v1971_v3 = vpop.f32.mrf.mxu0  ;;  %v2990_v48 = vld [vmem:[#allocation17_spill] sm:$0xff] }
 0x173   :  { %v2021_v22 = vpop.f32.mrf.mxu1  ;;  %v1193_v40 = vadd.f32 %v1971_v3, %v976_v35  ;;  %v799_v2 = vadd.f32 %v2990_v48, %v590_v41 }
 0x174   :  { %1476 = vst [vmem:[#allocation8 + $0x28] sm:$0xff] %v1460_v18  ;;  %v1459_v6 = vadd.f32 %v2807_v27, %v1328_v46  ;;  %v1346_v52 = vadd.f32 %v2021_v22, %v1169_v30  ;;  %v1186_v57 = vpop.f32.mrf.mxu0  ;;  %v2992_v18 = vld [vmem:[#allocation18_spill] sm:$0xff] }
 0x175   :  { %v1339_v12 = vpop.f32.mrf.mxu1  ;;  %v1187_v0 = vadd.f32 %v1186_v57, %v968_v16  ;;  %v792_v46 = vadd.f32 %v2992_v18, %v584_v23  ;;  %v1008_v62 = vadd.f32 %v2795_v36, %v799_v2 }
 0x176   :  { %1475 = vst [vmem:[#allocation8 + $0x20] sm:$0xff] %v1459_v6  ;;  %v1462_v49 = vadd.f32 %v2807_v27, %v1346_v52  ;;  %v1340_v13 = vadd.f32 %v1339_v12, %v1163_v44  ;;  %v1974_v5 = vpop.f32.mrf.mxu0 }
 0x177   :  { %v2024_v45 = vpop.f32.mrf.mxu1  ;;  %v1205_v26 = vadd.f32 %v1974_v5, %v992_v61  ;;  %v1000_v52 = vadd.f32 %v2798_v31, %v792_v46 }
 0x178   :  { %1478 = vst [vmem:[#allocation8 + $0x38] sm:$0xff] %v1462_v49  ;;  %v1461_v50 = vadd.f32 %v2807_v27, %v1340_v13  ;;  %v1358_v42 = vadd.f32 %v2024_v45, %v1181_v47  ;;  %v1198_v38 = vpop.f32.mrf.mxu0 }
 0x179   :  { %v1351_v33 = vpop.f32.mrf.mxu1  ;;  %v1199_v1 = vadd.f32 %v1198_v38, %v984_v39 }
 0x17a   :  { %1477 = vst [vmem:[#allocation8 + $0x30] sm:$0xff] %v1461_v50  ;;  %v1464_v14 = vadd.f32 %v2807_v27, %v1358_v42  ;;  %v1352_v4 = vadd.f32 %v1351_v33, %v1175_v25  ;;  %v1977_v15 = vpop.f32.mrf.mxu0 }
 0x17b   :  { %v2027_v43 = vpop.f32.mrf.mxu1  ;;  %v1217_v57 = vadd.f32 %v1977_v15, %v1008_v62 }
 0x17c   :  { %1480 = vst [vmem:[#allocation8 + $0x48] sm:$0xff] %v1464_v14  ;;  %v1463_v51 = vadd.f32 %v2807_v27, %v1352_v4  ;;  %v1370_v54 = vadd.f32 %v2027_v43, %v1193_v40  ;;  %v1210_v44 = vpop.f32.mrf.mxu0 }
 0x17d   :  { %v1363_v21 = vpop.f32.mrf.mxu1  ;;  %v1211_v20 = vadd.f32 %v1210_v44, %v1000_v52 }
 0x17e   :  { %1479 = vst [vmem:[#allocation8 + $0x40] sm:$0xff] %v1463_v51  ;;  %v1466_v58 = vadd.f32 %v2807_v27, %v1370_v54  ;;  %v1364_v30 = vadd.f32 %v1363_v21, %v1187_v0 }
 0x17f   :  { %v2030_v3 = vpop.f32.mrf.mxu1 }
 0x180   :  { %1482 = vst [vmem:[#allocation8 + $0x58] sm:$0xff] %v1466_v58  ;;  %v1465_v22 = vadd.f32 %v2807_v27, %v1364_v30  ;;  %v1382_v17 = vadd.f32 %v2030_v3, %v1205_v26 }
 0x181   :  { %v1375_v6 = vpop.f32.mrf.mxu1 }
 0x182   :  { %1481 = vst [vmem:[#allocation8 + $0x50] sm:$0xff] %v1465_v22  ;;  %v1468_v37 = vadd.f32 %v2807_v27, %v1382_v17  ;;  %v1376_v34 = vadd.f32 %v1375_v6, %v1199_v1 }
 0x183   :  { %v2033_v12 = vpop.f32.mrf.mxu1 }
 0x184   :  { %1484 = vst [vmem:[#allocation8 + $0x68] sm:$0xff] %v1468_v37  ;;  %v1467_v47 = vadd.f32 %v2807_v27, %v1376_v34  ;;  %v1394_v36 = vadd.f32 %v2033_v12, %v1217_v57 }
 0x185   :  { %v1387_v49 = vpop.f32.mrf.mxu1 }
 0x186   :  { %1483 = vst [vmem:[#allocation8 + $0x60] sm:$0xff] %v1467_v47  ;;  %v1470_v13 = vadd.f32 %v2807_v27, %v1394_v36  ;;  %v1388_v5 = vadd.f32 %v1387_v49, %v1211_v20 }
 0x188   :  { %1486 = vst [vmem:[#allocation8 + $0x78] sm:$0xff] %v1470_v13  ;;  %v1469_v31 = vadd.f32 %v2807_v27, %v1388_v5 }
 0x18a   :  { %1485 = vst [vmem:[#allocation8 + $0x70] sm:$0xff] %v1469_v31 }
 0x18b   :  { %2090 = shalt.err (!%p2087_p0)
}
 0x18c   :  { %1498 = dma.vmem_to_hbm [thread:$0]  %s1493_s24, 2048, %s2876_s3, [#allocation5], %s2106_s15, %s2106_s15, %s2107_s16  }
 0x18d   :  { %2103 = dma.done.wait [#allocation5], 2048  }
 0x18e   :  { %2104 = vsyncadd [#allocation5], 4294965248 }
 0x18f   :  { %1502 = vsyncpa [#allocation4], 1 }
 0x190   :  { %1503 = vsyncpa [#allocation7], 1 }
 0x191   :  { %1504 = vsyncpa [#allocation5], 1 }

</bundles_post_ra>
